<compile_context>
chip_gen: v7x
topology: tpu7x:2x2x1
jax: 0.10.0
libtpu: 0.0.40
codegen_flags: <defaults>
</compile_context>

<pallas_src>
import jax
import jax.numpy as jnp
from jax import lax
from jax.experimental import pallas as pl
from jax.experimental.pallas import tpu as pltpu


def _round_up(x, m):
    return ((x + m - 1) // m) * m


def _plan_tiling(d_model, max_rows, n_langs, target_block_bytes):
    """Pick the row tile (tn) and per-language padded row count (n_pad)."""
    row_bytes = d_model * 2                       # bf16 activations
    tn = target_block_bytes // row_bytes
    tn = max(1024, min(8192, tn))                 # amortize ~0.35us/step overhead
    tn = _round_up(tn, 128)
    tn = min(tn, _round_up(max_rows, 128))        # never over-pad tiny inputs
    n_pad = _round_up(max_rows, tn)
    # v7x has 2 TensorCores sharing the "parallel" grid axis: keep >= 2 blocks.
    if n_langs * (n_pad // tn) < 2 and n_pad > 128:
        tn = _round_up((n_pad + 1) // 2, 128)
        n_pad = _round_up(max_rows, tn)
    return tn, n_pad


# ---------------------------------------------------------------------------
# Pallas kernel: fused classifier + log-softmax NLL + masked argmax,
# transposed (C, TN) epilogue, lane-dense (1, TN) outputs.
# ---------------------------------------------------------------------------
def _event_head_kernel(x_ref, w_ref, b_ref, lbl_ref, preds_ref, nll_ref):
    x = x_ref[...]                                   # (TN, D) bf16   (streamed)
    w = w_ref[...]                                   # (C, D)  bf16   (resident)
    b = b_ref[...]                                   # (C, 1)  f32    (resident)

    # MXU matmul 'cd,td->ct' with f32 accumulation -> classes on sublanes, rows on lanes.
    logits = lax.dot_general(
        w, x, dimension_numbers=(((1,), (1,)), ((), ())),
        preferred_element_type=jnp.float32) + b      # (C, TN) f32

    c, tn = logits.shape
    lbl = lbl_ref[...]                               # (1, TN) int32
    valid = lbl >= 0                                 # (1, TN) bool

    # Numerically stable log-softmax over the class (sublane) axis.
    colmax = jnp.max(logits, axis=0, keepdims=True)              # (1, TN)
    z = logits - colmax                                          # (C, TN)
    lse = jnp.log(jnp.sum(jnp.exp(z), axis=0, keepdims=True))    # (1, TN)

    # Gather z[label] via a one-hot over the (small) class axis.
    cls = lax.broadcasted_iota(jnp.int32, (c, tn), 0)            # (C, TN)
    onehot = (cls == lbl).astype(jnp.float32)                    # (C, TN)
    picked = jnp.sum(z * onehot, axis=0, keepdims=True)          # (1, TN)

    # Per-row NLL; invalid (label < 0, incl. padding) rows contribute 0.
    nll_ref[...] = jnp.where(valid, lse - picked, jnp.zeros_like(lse))

    # argmax over classes (first occurrence); invalid positions carry the label through.
    idx = jnp.where(logits == colmax, cls, jnp.full((c, tn), c, jnp.int32))
    am = jnp.min(idx, axis=0, keepdims=True)                     # (1, TN) int32
    preds_ref[...] = jnp.where(valid, am, lbl)


# ---------------------------------------------------------------------------
# pallas_call wrapper: single fused, row-tiled dispatch over all languages
# ---------------------------------------------------------------------------
def event_head_pallas(x_all, l_blocks, w, bias, *, tn, vmem_limit_bytes=None):
    """x_all: (n_total, D) bf16 stacked slab; l_blocks: (num_blocks, 1, tn) int32;
    w: (C, D); bias: (C,).  Returns (preds, nll) each shaped (num_blocks, 1, tn)."""
    n_total, D = int(x_all.shape[0]), int(x_all.shape[1])
    num_blocks = int(l_blocks.shape[0])
    C = int(w.shape[0])
    assert n_total == num_blocks * tn

    w_bf = w.astype(jnp.bfloat16)                       # (C, D)
    b2 = bias.reshape(C, 1).astype(jnp.float32)         # (C, 1)

    cost = pl.CostEstimate(
        flops=2 * n_total * D * C,
        transcendentals=n_total * C,
        bytes_accessed=n_total * D * 2 + C * D * 2 + n_total * 4 * 3,
    )

    if vmem_limit_bytes is None:
        # double-buffered x blocks + headroom; explicit so v5e's 16 MiB default
        # scoped limit never constrains the larger tiles.
        vmem_limit_bytes = max(32 * 1024 * 1024, 2 * tn * D * 2 + (8 << 20))

    grid_spec = pltpu.PrefetchScalarGridSpec(
        num_scalar_prefetch=0,
        grid=(num_blocks,),
        in_specs=[
            pl.BlockSpec((tn, D), lambda i: (i, 0)),            # x: streamed / double-buffered
            # W / bias: constant block index -> fetched once, VMEM-resident.
            pl.BlockSpec((C, D), lambda i: (0, 0)),
            pl.BlockSpec((C, 1), lambda i: (0, 0)),
            pl.BlockSpec((None, 1, tn), lambda i: (i, 0, 0)),   # labels: lane-dense (1, tn)
        ],
        out_specs=(
            pl.BlockSpec((None, 1, tn), lambda i: (i, 0, 0)),   # preds: lane-dense
            pl.BlockSpec((None, 1, tn), lambda i: (i, 0, 0)),   # per-row nll: lane-dense
        ),
    )

    preds, nll = pl.pallas_call(
        _event_head_kernel,
        out_shape=(
            jax.ShapeDtypeStruct((num_blocks, 1, tn), jnp.int32),
            jax.ShapeDtypeStruct((num_blocks, 1, tn), jnp.float32),
        ),
        grid_spec=grid_spec,
        compiler_params=pltpu.CompilerParams(
            dimension_semantics=("parallel",),    # no carried state -> megacore-friendly
            vmem_limit_bytes=int(vmem_limit_bytes),
        ),
        cost_estimate=cost,
    )(x_all, w_bf, b2, l_blocks)
    return preds, nll


# ---------------------------------------------------------------------------
# SupFilterIE (JAX side): parameter setup + forward == event_forward
# ---------------------------------------------------------------------------
class SupFilterIEPallas:
    D_MODEL = 128  # stand-in for the hard-coded 1024 d_model in the torch module

    def __init__(self, hidden_dim, nclass, filter_k, filter_m, vocab_size, key,
                 target_block_bytes=4 * 1024 * 1024):
        # target_block_bytes: ~2-4 MiB for v5e/v6e, ~8 MiB recommended on v7x (3.2 TB/s HBM).
        if isinstance(nclass, int):
            nclass = {'event': nclass, 'relation': nclass, 'role': nclass}
        self.hidden_dim = hidden_dim
        self.nclass = nclass
        self.target_block_bytes = int(target_block_bytes)
        d = self.D_MODEL
        k_emb, k_w, k_b = jax.random.split(key, 3)
        # TODO(synk): _FilterModel (the pretrained LM) definition is not provided;
        # substituted with a deterministic bf16 embedding lookup producing (B, L, d_model),
        # which lets the encoder emit the kernel's stacked bf16 slab directly.
        self.embedding = (jax.random.normal(k_emb, (vocab_size, d), jnp.float32)
                          * 0.02).astype(jnp.bfloat16)
        # event_cls = nn.Linear(d_model, nclass['event']); weight stored (out, in) like torch.
        bound = 1.0 / (d ** 0.5)
        self.event_w = jax.random.uniform(
            k_w, (nclass['event'], d), jnp.float32, -bound, bound)
        self.event_b = jax.random.uniform(
            k_b, (nclass['event'],), jnp.float32, -bound, bound)
        # dim_map is None because hidden_dim == d_model (same condition as torch code).
        assert hidden_dim == d, "keep hidden_dim == d_model so dim_map is None"
        # relation_cls / role_cls / role_event_cls / event_crf are unused by forward().

    def get_encoded(self, batch):
        # per-language list of (B, L, d_model) bf16 (API parity with the torch module)
        return [self.embedding[ids] for ids in batch['input_ids']]

    def event_forward(self, batch):
        """loss_lang=None, self_training=False path of the torch event_forward."""
        ids_list = batch['input_ids']
        labels_list = batch['trigger_labels']
        n_langs = len(ids_list)
        D = self.D_MODEL

        rows = [int(a.shape[0]) * int(a.shape[1]) for a in ids_list]
        tn, n_pad = _plan_tiling(D, max(rows), n_langs, self.target_block_bytes)
        blocks_per_lang = n_pad // tn
        num_blocks = n_langs * blocks_per_lang

        # Encoder emits the stacked (n_total, D) bf16 slab directly: only the tiny int32
        # token ids / labels are padded & concatenated, never the D-wide activations.
        ids_parts, lbl_parts = [], []
        for ids, lbl, n in zip(ids_list, labels_list, rows):
            ids_parts.append(jnp.pad(ids.reshape(-1).astype(jnp.int32), (0, n_pad - n)))
            lbl_parts.append(jnp.pad(lbl.reshape(-1).astype(jnp.int32), (0, n_pad - n),
                                     constant_values=-1))
        ids_all = jnp.concatenate(ids_parts, axis=0)              # (n_total,) int32 (tiny)
        x_all = self.embedding[ids_all]                           # (n_total, D) bf16 slab
        l_blocks = jnp.concatenate(lbl_parts, axis=0).reshape(num_blocks, 1, tn)

        preds_blk, nll_blk = event_head_pallas(
            x_all, l_blocks, self.event_w, self.event_b, tn=tn)

        # Per-language CrossEntropyLoss(reduction='mean') over labels >= 0, then summed.
        # Valid counts come from the labels with a plain XLA reduction (no kernel output).
        nll_lang = nll_blk.reshape(n_langs, n_pad).sum(axis=1)
        cnt_lang = jnp.stack([jnp.sum((lbl >= 0).astype(jnp.float32)) for lbl in labels_list])
        loss_lang = jnp.where(cnt_lang > 0, nll_lang / jnp.maximum(cnt_lang, 1.0),
                              jnp.zeros_like(nll_lang))
        total_loss = jnp.sum(loss_lang)

        preds_all = preds_blk.reshape(n_langs, n_pad)
        preds_list = []
        for lang, (ids, n) in enumerate(zip(ids_list, rows)):
            B, L = int(ids.shape[0]), int(ids.shape[1])
            preds_list.append(preds_all[lang, :n].reshape(B, L))
        return preds_list, total_loss

    def forward(self, batch):
        preds_list, total_loss = self.event_forward(batch)
        labels = batch['trigger_labels']
        return {'loss': total_loss,
                'prediction': preds_list[0].astype(jnp.int32),
                'label': labels[0].astype(jnp.int32)}


# ---------------------------------------------------------------------------
# Pure-JAX reference (for correctness check; uses the same bf16-cast inputs)
# ---------------------------------------------------------------------------
def _reference_event_head(x_bf16, labels, w, b):
    logits = x_bf16.astype(jnp.float32) @ w.astype(jnp.float32).T + b
    logp = jax.nn.log_softmax(logits, axis=-1)
    valid = labels >= 0
    safe = jnp.where(valid, labels, 0)
    nll = -jnp.take_along_axis(logp, safe[..., None], axis=-1)[..., 0]
    cnt = valid.sum()
    loss = jnp.where(cnt > 0,
                     jnp.where(valid, nll, 0.0).sum() / jnp.maximum(cnt, 1),
                     0.0)
    preds = jnp.argmax(logits, axis=-1).astype(jnp.int32)
    preds = jnp.where(valid, preds, labels)
    return preds, loss


if __name__ == "__main__":
    key = jax.random.PRNGKey(0)
    k_model, k_ids0, k_ids1, k_lbl0, k_lbl1 = jax.random.split(key, 5)

    B, L = 2, 16
    D_MODEL = SupFilterIEPallas.D_MODEL        # 128 (stand-in for 1024)
    NCLASS = 8
    VOCAB = 50
    N_LANGS = 2

    model = SupFilterIEPallas(hidden_dim=D_MODEL, nclass=NCLASS,
                              filter_k=3, filter_m=2, vocab_size=VOCAB, key=k_model)

    input_ids = [
        jax.random.randint(k_ids0, (B, L), 0, VOCAB, jnp.int32),
        jax.random.randint(k_ids1, (B, L), 0, VOCAB, jnp.int32),
    ]
    # trigger labels in [-1, NCLASS); -1 == ignored position (padding)
    trigger_labels = [
        jax.random.randint(k_lbl0, (B, L), -1, NCLASS, jnp.int32),
        jax.random.randint(k_lbl1, (B, L), -1, NCLASS, jnp.int32),
    ]
    batch = {'input_ids': input_ids,
             'attention_mask': [jnp.ones((B, L), jnp.int32)] * N_LANGS,
             'trigger_labels': trigger_labels}

    out = model.forward(batch)
    jax.block_until_ready(out['loss'])
    jax.block_until_ready(out['prediction'])

    # Verify against the pure-JAX reference (same bf16 activations/weights,
    # f32-accumulated matmul, so only summation-order differences remain).
    w_bf = model.event_w.astype(jnp.bfloat16)
    ref_loss = jnp.float32(0.0)
    ref_preds0 = None
    for lang in range(N_LANGS):
        enc_bf = model.embedding[input_ids[lang]]            # bf16 already
        p, l = _reference_event_head(enc_bf, trigger_labels[lang], w_bf, model.event_b)
        ref_loss = ref_loss + l
        if lang == 0:
            ref_preds0 = p
    assert jnp.allclose(out['loss'], ref_loss, rtol=1e-4, atol=1e-4), (out['loss'], ref_loss)
    assert jnp.array_equal(out['prediction'], ref_preds0)

    print("KERNEL_OK")
</pallas_src>

<mosaic_0001>
module attributes {stable_mosaic.version = 11 : i64} {
  func.func @_event_head_kernel(%arg0: i32, %arg1: memref<128x128xbf16, #tpu.memory_space<vmem>>, %arg2: memref<8x128xbf16, #tpu.memory_space<vmem>>, %arg3: memref<8x1xf32, #tpu.memory_space<vmem>>, %arg4: memref<1x1x128xi32, #tpu.memory_space<vmem>>, %arg5: memref<1x1x128xi32, #tpu.memory_space<vmem>>, %arg6: memref<1x1x128xf32, #tpu.memory_space<vmem>>) attributes {dimension_semantics = [#tpu.dimension_semantics<parallel>], iteration_bounds = array<i64: 2>, scalar_prefetch = 0 : i64, scratch_operands = 0 : i64, tpu.core_type = #tpu.core_type<tc>, window_params = [{transform_indices = @transform_0, window_bounds = array<i64: 128, 128>}, {pipeline_mode = #tpu.pipeline_mode<synchronous>, transform_indices = @transform_1, window_bounds = array<i64: 8, 128>}, {pipeline_mode = #tpu.pipeline_mode<synchronous>, transform_indices = @transform_2, window_bounds = array<i64: 8, 1>}, {transform_indices = @transform_3, window_bounds = array<i64: 1, 1, 128>}, {transform_indices = @transform_4, window_bounds = array<i64: 1, 1, 128>}, {transform_indices = @transform_5, window_bounds = array<i64: 1, 1, 128>}]} {
    %c0 = arith.constant 0 : index
    %c0_0 = arith.constant 0 : index
    %0 = vector.load %arg1[%c0, %c0_0] : memref<128x128xbf16, #tpu.memory_space<vmem>>, vector<128x128xbf16>
    %c0_1 = arith.constant 0 : index
    %c0_2 = arith.constant 0 : index
    %1 = vector.load %arg2[%c0_1, %c0_2] : memref<8x128xbf16, #tpu.memory_space<vmem>>, vector<8x128xbf16>
    %c0_3 = arith.constant 0 : index
    %c0_4 = arith.constant 0 : index
    %2 = vector.load %arg3[%c0_3, %c0_4] : memref<8x1xf32, #tpu.memory_space<vmem>>, vector<8x1xf32>
    %cst = arith.constant dense<0.000000e+00> : vector<8x128xf32>
    %3 = tpu.matmul %1, %0, %cst {dimension_numbers = #tpu.dot_dimension_numbers<[1], [1], [0], [0], [0, 0, 1, 0], [], []>} : vector<8x128xbf16>, vector<128x128xbf16>, vector<8x128xf32> -> vector<8x128xf32>
    %4 = vector.broadcast %2 : vector<8x1xf32> to vector<8x128xf32>
    %5 = arith.addf %3, %4 : vector<8x128xf32>
    %c0_5 = arith.constant 0 : index
    %c0_6 = arith.constant 0 : index
    %c0_7 = arith.constant 0 : index
    %6 = vector.load %arg4[%c0_5, %c0_6, %c0_7] : memref<1x1x128xi32, #tpu.memory_space<vmem>>, vector<1x1x128xi32>
    %7 = vector.shape_cast %6 : vector<1x1x128xi32> to vector<1x128xi32>
    %c0_i32 = arith.constant 0 : i32
    %8 = vector.broadcast %c0_i32 : i32 to vector<1x128xi32>
    %9 = arith.cmpi sge, %7, %8 : vector<1x128xi32>
    %cst_8 = arith.constant dense<0xFF800000> : vector<128xf32>
    %10 = vector.multi_reduction <maximumf>, %5, %cst_8 [0] : vector<8x128xf32> to vector<128xf32>
    %11 = vector.shape_cast %10 : vector<128xf32> to vector<1x128xf32>
    %12 = vector.broadcast %11 : vector<1x128xf32> to vector<8x128xf32>
    %13 = arith.subf %5, %12 : vector<8x128xf32>
    %14 = math.exp %13 : vector<8x128xf32>
    %cst_9 = arith.constant dense<0.000000e+00> : vector<128xf32>
    %15 = vector.multi_reduction <add>, %14, %cst_9 [0] : vector<8x128xf32> to vector<128xf32>
    %16 = vector.shape_cast %15 : vector<128xf32> to vector<1x128xf32>
    %17 = math.log %16 : vector<1x128xf32>
    %18 = tpu.iota {dimensions = array<i32: 0>} : vector<8x128xi32>
    %19 = vector.broadcast %7 : vector<1x128xi32> to vector<8x128xi32>
    %20 = arith.cmpi eq, %18, %19 : vector<8x128xi32>
    %21 = arith.extui %20 : vector<8x128xi1> to vector<8x128xi32>
    %22 = arith.sitofp %21 : vector<8x128xi32> to vector<8x128xf32>
    %23 = arith.mulf %13, %22 : vector<8x128xf32>
    %cst_10 = arith.constant dense<0.000000e+00> : vector<128xf32>
    %24 = vector.multi_reduction <add>, %23, %cst_10 [0] : vector<8x128xf32> to vector<128xf32>
    %25 = vector.shape_cast %24 : vector<128xf32> to vector<1x128xf32>
    %26 = arith.subf %17, %25 : vector<1x128xf32>
    %cst_11 = arith.constant 0.000000e+00 : f32
    %27 = vector.broadcast %cst_11 : f32 to vector<1x128xf32>
    %28 = arith.select %9, %26, %27 : vector<1x128xi1>, vector<1x128xf32>
    %c0_12 = arith.constant 0 : index
    %c0_13 = arith.constant 0 : index
    %c0_14 = arith.constant 0 : index
    %29 = vector.load %arg6[%c0_12, %c0_13, %c0_14] : memref<1x1x128xf32, #tpu.memory_space<vmem>>, vector<1x1x128xf32>
    %30 = vector.shape_cast %29 : vector<1x1x128xf32> to vector<1x128xf32>
    %31 = vector.shape_cast %28 : vector<1x128xf32> to vector<1x1x128xf32>
    tpu.vector_store %arg6[%c0_12, %c0_13, %c0_14], %31 {strides = array<i32>} : memref<1x1x128xf32, #tpu.memory_space<vmem>>, vector<1x1x128xf32>,
    %32 = vector.broadcast %11 : vector<1x128xf32> to vector<8x128xf32>
    %33 = arith.cmpf oeq, %5, %32 : vector<8x128xf32>
    %c8_i32 = arith.constant 8 : i32
    %34 = vector.broadcast %c8_i32 : i32 to vector<8x128xi32>
    %35 = arith.select %33, %18, %34 : vector<8x128xi1>, vector<8x128xi32>
    %cst_15 = arith.constant dense<2147483647> : vector<128xi32>
    %36 = vector.multi_reduction <minsi>, %35, %cst_15 [0] : vector<8x128xi32> to vector<128xi32>
    %37 = vector.shape_cast %36 : vector<128xi32> to vector<1x128xi32>
    %38 = arith.select %9, %37, %7 : vector<1x128xi1>, vector<1x128xi32>
    %c0_16 = arith.constant 0 : index
    %c0_17 = arith.constant 0 : index
    %c0_18 = arith.constant 0 : index
    %39 = vector.load %arg5[%c0_16, %c0_17, %c0_18] : memref<1x1x128xi32, #tpu.memory_space<vmem>>, vector<1x1x128xi32>
    %40 = vector.shape_cast %39 : vector<1x1x128xi32> to vector<1x128xi32>
    %41 = vector.shape_cast %38 : vector<1x128xi32> to vector<1x1x128xi32>
    tpu.vector_store %arg5[%c0_16, %c0_17, %c0_18], %41 {strides = array<i32>} : memref<1x1x128xi32, #tpu.memory_space<vmem>>, vector<1x1x128xi32>,
    return
  }
  func.func @transform_0(%arg0: i32) -> (i32, i32) {
    %c0_i32 = arith.constant 0 : i32
    %c0_i32_0 = arith.constant 0 : i32
    return %arg0, %c0_i32 : i32, i32
  }
  func.func @transform_1(%arg0: i32) -> (i32, i32) {
    %c0_i32 = arith.constant 0 : i32
    %c0_i32_0 = arith.constant 0 : i32
    %c0_i32_1 = arith.constant 0 : i32
    return %c0_i32, %c0_i32_0 : i32, i32
  }
  func.func @transform_2(%arg0: i32) -> (i32, i32) {
    %c0_i32 = arith.constant 0 : i32
    %c0_i32_0 = arith.constant 0 : i32
    %c0_i32_1 = arith.constant 0 : i32
    return %c0_i32, %c0_i32_0 : i32, i32
  }
  func.func @transform_3(%arg0: i32) -> (i32, i32, i32) {
    %c0_i32 = arith.constant 0 : i32
    %c0_i32_0 = arith.constant 0 : i32
    %c0_i32_1 = arith.constant 0 : i32
    return %arg0, %c0_i32, %c0_i32_0 : i32, i32, i32
  }
  func.func @transform_4(%arg0: i32) -> (i32, i32, i32) {
    %c0_i32 = arith.constant 0 : i32
    %c0_i32_0 = arith.constant 0 : i32
    %c0_i32_1 = arith.constant 0 : i32
    return %arg0, %c0_i32, %c0_i32_0 : i32, i32, i32
  }
  func.func @transform_5(%arg0: i32) -> (i32, i32, i32) {
    %c0_i32 = arith.constant 0 : i32
    %c0_i32_0 = arith.constant 0 : i32
    %c0_i32_1 = arith.constant 0 : i32
    return %arg0, %c0_i32, %c0_i32_0 : i32, i32, i32
  }
}

</mosaic_0001>

<bundles_post_ra>
// kernel: tpu_custom_call.1
= control target key start
LH: loop header
LB: loop body
LE: loop exit
PB: predicated region body
PF: predicated region fallthrough
CT: control target
= control target key end

     0   :  { %11 = vsyncpa [#allocation3], 0  ;;  %s1086_s0 = inlined_call_operand.hbm [shape: bf16[256,128], index: 0, kind: input, shape index: {}]   ;;  %s1087_s1 = inlined_call_operand.vmem [shape: bf16[8,128], index: 1, kind: input, shape index: {}]   ;;  %s1088_s2 = inlined_call_operand.vmem [shape: f32[8,1], index: 2, kind: input, shape index: {}]   ;;  %s1089_s3 = inlined_call_operand.vmem [shape: s32[2,1,128], index: 3, kind: input, shape index: {}]   ;;  %s1090_s4 = inlined_call_operand.hbm [shape: s32[2,1,128], index: 4, kind: output, shape index: {0}]   ;;  %s1091_s5 = inlined_call_operand.hbm [shape: f32[2,1,128], index: 5, kind: output, shape index: {1}]  }
   0x1   :  { %13 = vsyncpa [#allocation3 + $0x1], 0 }
   0x2   :  { %14 = vsyncpa [#allocation4], 0 }
   0x3   :  { %16 = vsyncpa [#allocation4 + $0x1], 0 }
   0x4   :  { %17 = vsyncpa [#allocation7], 0 }
   0x5   :  { %19 = vsyncpa [#allocation7 + $0x1], 0  ;;  %s851_s18 = smov 0   ;;  %s853_s19 = smov 0  }
   0x6   :  { %s855_s20 = smov 0   ;;  %s857_s21 = smov 0  }
   0x7 LB: > { %s872_s22 = sadd.s32 4294967295, %s811_s21   ;;  %s563_s23 = sadd.s32 4294967294, %s811_s21   ;;  %s811_s21 = sphi %s857_s21, %s1104_s21   ;;  %s807_s20 = sphi %s855_s20, %s1103_s20   ;;  %s803_s19 = sphi %s853_s19, %s1102_s19   ;;  %s799_s18 = sphi %s851_s18, %s1101_s18  }
   0x8   : > { %s876_s24 = sadd.s32 1, %s811_s21   ;;  %s32_s25 = sadd.s32 1, %s807_s20 }
   0x9   : > { %s29_s26 = ssub.s32 %s811_s21, %s876_s24  ;;  %p39_p0 = scmp.ne.s32.totalorder %s807_s20, %s803_s19 }
   0xa   : > { %p30_p1 = scmp.eq.s32.totalorder %s29_s26, 0  ;;  %p40_p2 = scmp.eq.s32.totalorder %s811_s21, 0 }
   0xb   : > { %p45_p3 = scmp.ne.s32.totalorder %s803_s19, %s799_s18  ;;  %p46_p4 = scmp.eq.s32.totalorder %s872_s22, 0 }
   0xc   : > { %s888_s27 = scalar_select %p30_p1, %s807_s20, %s32_s25  }
   0xd   : > { %p890_p5 = por %p40_p2, %p39_p0  ;;  %p894_p6 = por %p46_p4, %p45_p3 }
   0xe   : > { %p137_p7 = scmp.eq.s32.totalorder %s872_s22, 1  ;;  %p143_p8 = scmp.eq.s32.totalorder %s563_s23, 1 }
   0xf   : > { %p631_p10 = scmp.lt.s32.totalorder %s811_s21, 2  ;;  %s195_s7 = sand.u32 1, %s807_s20  }
  0x10   : > { %p901_p11 = por %p137_p7, %p39_p0  ;;  %p905_p12 = por %p143_p8, %p45_p3 }
  0x11   : > { %s584_s8 = sshll.u32 %s811_s21, 10  ;;  %s566_s9 = sshll.u32 %s195_s7, 6 }
  0x12   : > { %s1095_s30 = scalar_select %p901_p11, 1, 0 }
  0x13   : > { %s1096_s6 = scalar_select %p905_p12, 1, 0 }
  0x14   : > { %s914_s12 = scalar_lea.hbm %s1086_s0, %s584_s8  ;;  %s199_s13 = scalar_lea.vmem [#allocation2], %s566_s9 }
  0x15   : > { %s206_s14 = sshll.u32 %s199_s13, 4  ;;  %p918_p13 = pnand %p631_p10, %p890_p5  ;;  %s922_s14 = int_to_ptr.vmem [resolvable:$true] %s206_s14 }
  0x16   : > { %s924_s16 = scalar_lea.sflag [#allocation3], %s195_s7  ;;  %s683_s17 = scalar_lea.hbm %s914_s12, 1024 }
  0x17   : > { %p684_p0 = scmp.ne.s32.totalorder %s914_s12, %s683_s17  ;;  %p685_p1 = pneg %p918_p13 }
  0x18   : > { %s688_s26 = scalar_lea.hbm %s1086_s0, 2048  ;;  %p689_p4 = scmp.lt.u32.totalorder %s914_s12, %s1086_s0 }
  0x19   : > { %p686_p2 = pnand %p685_p1, %p684_p0  ;;  %p690_p5 = scmp.lt.u32.totalorder %s688_s26, %s683_s17 }
  0x1a   : > { %p692_p8 = scmp.lt.u32.totalorder %s683_s17, %s914_s12 }
  0x1b   : > { %p687_p3 = pneg %p686_p2  ;;  %p691_p7 = por %p690_p5, %p689_p4 }
  0x1d   : > { %p693_p10 = por %p692_p8, %p691_p7 }
  0x1f   : > { %p694_p9 = pnand %p693_p10, %p687_p3 }
  0x21   : > { %697 = shalt.err (!%p694_p9)
}
  0x22   : > { %s698_s7 = scalar_lea.vmem %s922_s14, 1024  ;;  %s813_s9 = smov [#allocation2]  }
  0x23   : > { %p699_p0 = scmp.ne.s32.totalorder %s922_s14, %s698_s7  ;;  %s703_s10 = sshll.u32 %s813_s9, 4  ;;  %s704_s10 = int_to_ptr.vmem [resolvable:$false] %s703_s10 }
  0x24   : > { %s705_s11 = scalar_lea.vmem %s704_s10, 2048  ;;  %p706_p11 = scmp.lt.s32.totalorder %s922_s14, %s704_s10 }
  0x25   : > { %p701_p2 = pnand %p699_p0, %p685_p1  ;;  %p707_p4 = scmp.lt.s32.totalorder %s705_s11, %s698_s7 }
  0x27   : > { %p702_p12 = pneg %p701_p2  ;;  %p708_p5 = por %p707_p4, %p706_p11 }
  0x29   : > { %p709_p7 = pnand %p708_p5, %p702_p12 }
  0x2b   : > { %712 = shalt.err (!%p709_p7)
}
  0x2c   : > { %s814_s13 = smov 64   ;;  %s815_s17 = smov 4  }
  0x2d   : > { %623 = dma.hbm_to_vmem [thread:$0]  (!%p918_p13), %s914_s12, 1024, %s922_s14, %s924_s16, %s814_s13, %s814_s13, %s815_s17  }
  0x2e   : > { %p569_p9 = scmp.ge.s32.totalorder %s811_s21, 1  ;;  %p220_p1 = scmp.lt.s32.totalorder %s811_s21, 3 }
  0x30   : > { %p221_p3 = pnand %p569_p9, %p220_p1 }
  0x31   : > { %s955_s23 = sand.u32 (!%p221_p3), 1, %s803_s19  }
  0x32   : > { %224 = sbr.rel (%p221_p3) target bundleno = 417 (0x1a1), region = 36  ;;  %s570_s25 = sshll.u32 (!%p221_p3), %s955_s23, 6 }
  0x33   : > { %s227_s26 = scalar_lea.sflag (!%p221_p3), [#allocation3], %s955_s23  ;;  %s959_s28 = scalar_lea.vmem (!%p221_p3), [#allocation2], %s570_s25 }
  0x39   : > { %786 = dma.done.wait (%p894_p6), %s227_s26, 1024  }
  0x3a   : > { %788 = vsyncadd (%p894_p6), %s227_s26, 4294966272  ;;  %v816_v0 = vmov 0.0   ;;  %vm817_vm0 = vmmov 0   ;;  %v818_v1 = vmov 0   ;;  %v671_v2 = vld [vmem:[%s959_s28] sm:$0xff]   ;;  %v672_v3 = vld [vmem:[%s959_s28 + $0x8] sm:$0xff]   ;;  %v398_v21 = vlaneseq }
  0x3b   : > { %594 = vmatprep.subr.bf16.mxu0 %v816_v0  ;;  %610 = vmatprep.mubr.msk.bf16.mxu0 %vm817_vm0, %v816_v0  ;;  %v285_v4 = vld [vmem:[%s1088_s2] sm:$0xff]  ;;  %v673_v5 = vld [vmem:[%s959_s28 + $0x10] sm:$0xff]   ;;  %v674_v6 = vld [vmem:[%s959_s28 + $0x18] sm:$0xff]   ;;  %p264_p6 = scmp.lt.s32.totalorder %s872_s22, 1  ;;  %s580_s10 = sshll.u32 %s872_s22, 4 }
  0x3c   : > { %670 = vset.pattern.permute.xlu0 %v818_v1  ;;  %595 = vmatpush3.bf16.xpose.msra.mxu0 %v671_v2  ;;  %v675_v7 = vld [vmem:[%s959_s28 + $0x20] sm:$0xff]   ;;  %v676_v8 = vld [vmem:[%s959_s28 + $0x28] sm:$0xff]   ;;  %v677_v9 = vld [vmem:[%s959_s28 + $0x30] sm:$0xff]   ;;  %v399_v24 = vshrl.u32 %v398_v21, 7  ;;  %s256_s11 = scalar_lea.vmem [#allocation5], %s955_s23  ;;  %s1005_s26 = scalar_lea.hbm %s1090_s4, %s580_s10 }
  0x3d   : > { %596 = vmatprep.subr.bf16.mxu0 %v816_v0  ;;  %288 = vperm.xlu0 %670, %v285_v4   ;;  %v678_v10 = vld [vmem:[%s959_s28 + $0x38] sm:$0xff]   ;;  %v284_v11 = vld [vmem:[%s1087_s1] sm:$0xf]  ;;  %s265_s16 = scalar_select %p264_p6, %s872_s22, 1 }
  0x3e   : > { %v402_v27 = vsub.s32 0, %v399_v24  ;;  %s447_s13 = sshll.u32 %s256_s11, 4  ;;  %s431_s28 = scalar_lea.sflag [#allocation4], %s955_s23  ;;  %s1007_s13 = int_to_ptr.vmem [resolvable:$true] %s447_s13 }
  0x3f   : > { %s266_s9 = scalar_lea.vmem %s1089_s3, %s265_s16  ;;  %s713_s29 = scalar_lea.vmem %s1007_s13, 16 }
  0x40   : > { %v993_v29 = vld [vmem:[%s266_s9] sm:$0x1]  ;;  %p714_p11 = scmp.ne.s32.totalorder %s1007_s13, %s713_s29  ;;  %p1098_p12 = scmp.ne.s32.totalorder %s1095_s30, 0 }
  0x41   : > { %v403_v32 = vrot.slane %v993_v29, %v402_v27  ;;  %vm380_vm5 = vcmp.ge.s32.totalorder %v993_v29, 0  ;;  %s819_s12 = smov [#allocation5]  }
  0x42   : > { %p715_p13 = pnand %p714_p11, %p1098_p12  ;;  %s717_s14 = sshll.u32 %s819_s12, 4  ;;  %s718_s14 = int_to_ptr.vmem [resolvable:$false] %s717_s14 }
  0x43   : > { %vm404_vm4 = vcmp.eq.s32.totalorder %v399_v24, %v403_v32  ;;  %s719_s15 = scalar_lea.vmem %s718_s14, 32  ;;  %p720_p10 = scmp.lt.s32.totalorder %s1007_s13, %s718_s14 }
  0x44   : > { %597 = vmatpush3.bf16.xpose.msra.mxu0 %v672_v3  ;;  %v579_v37 = vsel %vm404_vm4, 1.0, %v816_v0  ;;  %p716_p8 = pneg %p715_p13  ;;  %p721_p0 = scmp.lt.s32.totalorder %s719_s15, %s713_s29 }
  0x45   : > { %598 = vmatprep.subr.bf16.mxu0 %v816_v0 }
  0x46   : > { %p722_p2 = por %p721_p0, %p720_p10 }
  0x48   : > { %p723_p4 = pnand %p722_p2, %p716_p8 }
  0x4c   : > { %599 = vmatpush3.bf16.xpose.msra.mxu0 %v673_v5 }
  0x4d   : > { %600 = vmatprep.subr.bf16.mxu0 %v816_v0 }
  0x54   : > { %601 = vmatpush3.bf16.xpose.msra.mxu0 %v674_v6 }
  0x55   : > { %602 = vmatprep.subr.bf16.mxu0 %v816_v0 }
  0x5c   : > { %603 = vmatpush3.bf16.xpose.msra.mxu0 %v675_v7 }
  0x5d   : > { %604 = vmatprep.subr.bf16.mxu0 %v816_v0 }
  0x64   : > { %605 = vmatpush3.bf16.xpose.msra.mxu0 %v676_v8 }
  0x65   : > { %606 = vmatprep.subr.bf16.mxu0 %v816_v0 }
  0x6c   : > { %607 = vmatpush3.bf16.xpose.msra.mxu0 %v677_v9 }
  0x6d   : > { %608 = vmatprep.subr.bf16.mxu0 %v816_v0 }
  0x74   : > { %609 = vmatpush3.bf16.xpose.msra.mxu0 %v678_v10 }
  0x7b   : > { %611 = vmatmul.mubr.bf16.vlgmr.msra.gmra.mrb[0].mxu0 %v284_v11 }
  0xbc   : > { %v289_v12 = vpop.permute.xlu0 %288 }
 0x14e   : > { %v373_v13 = vpop.f32.mrb[0].mxu0 }
 0x14f   : > { %v374_v14 = vadd.f32 %v373_v13, %v289_v12  ;;  %v612_v15 = vpop.f32.mrb[1].mxu0 }
 0x150   : > { %v376_v16 = vpop.f32.mrb[2].mxu0 }
 0x151   : > { %v381_v17 = vrot.slane %v374_v14, 4  ;;  %v613_v18 = vpop.f32.mrb[3].mxu0 }
 0x153   : > { %v382_v19 = vmax.f32 %v374_v14, %v381_v17 }
 0x155   : > { %v383_v20 = vrot.slane %v382_v19, 2 }
 0x157   : > { %v384_v22 = vmax.f32 %v382_v19, %v383_v20 }
 0x159   : > { %v385_v23 = vrot.slane %v384_v22, 1 }
 0x15b   : > { %v386_v25 = vmax.f32 %v384_v22, %v385_v23 }
 0x15d   : > { %v387_v26 = vsub.f32 %v374_v14, %v386_v25  ;;  %vm417_vm1 = vcmp.eq.f32.partialorder %v374_v14, %v386_v25 }
 0x15e   : > { %v418_v28 = vsel %vm417_vm1, %v399_v24, 8 }
 0x15f   : > { %v388_v30 = vmul.f32 1.442695, %v387_v26  ;;  %v419_v31 = vrot.slane %v418_v28, 4  ;;  %v407_v40 = vmul.f32 %v579_v37, %v387_v26 }
 0x161   : > { %679 = vpow2.f32 %v388_v30  ;;  %vm420_vm2 = vcmp.lt.s32.totalorder %v418_v28, %v419_v31 }
 0x162   : > { %v421_v33 = vsel %vm420_vm2, %v418_v28, %v419_v31 }
 0x163   : > { %v422_v34 = vrot.slane %v421_v33, 2 }
 0x165   : > { %vm423_vm3 = vcmp.lt.s32.totalorder %v421_v33, %v422_v34 }
 0x166   : > { %v424_v35 = vsel %vm423_vm3, %v421_v33, %v422_v34 }
 0x167   : > { %v425_v36 = vrot.slane %v424_v35, 1 }
 0x169   : > { %vm426_vm6 = vcmp.lt.s32.totalorder %v424_v35, %v425_v36 }
 0x16a   : > { %v427_v38 = vsel %vm426_vm6, %v424_v35, %v425_v36 }
 0x16b   : > { %v680_v39 = vpop.eup %679  ;;  %v428_v41 = vsel %vm380_vm5, %v427_v38, %v993_v29 }
 0x16c   : > { %429 = vst [vmem:[%s256_s11] sm:$0x1] %v428_v41  ;;  %v390_v42 = vrot.slane %v680_v39, 4 }
 0x16d   : > { %726 = shalt.err (!%p723_p4)
}
 0x16e   : > { %s727_s16 = scalar_lea.hbm %s1005_s26, 16  ;;  %s731_s9 = scalar_lea.hbm %s1090_s4, 32 }
 0x16f   : > { %p728_p5 = scmp.ne.s32.totalorder %s1005_s26, %s727_s16  ;;  %p732_p1 = scmp.lt.u32.totalorder %s1005_s26, %s1090_s4 }
 0x170   : > { %p733_p3 = scmp.lt.u32.totalorder %s731_s9, %s727_s16  ;;  %p735_p11 = scmp.lt.u32.totalorder %s727_s16, %s1005_s26 }
 0x171   : > { %p729_p7 = pnand %p728_p5, %p1098_p12 }
 0x172   : > { %p734_p6 = por %p733_p3, %p732_p1 }
 0x173   : > { %p730_p9 = pneg %p729_p7 }
 0x174   : > { %p736_p13 = por %p735_p11, %p734_p6 }
 0x176   : > { %p737_p8 = pnand %p736_p13, %p730_p9 }
 0x178   : > { %740 = shalt.err (!%p737_p8)
}
 0x179   : > { %616 = dma.vmem_to_hbm [thread:$0]  (%p1098_p12), %s1007_s13, 16, %s1005_s26, %s431_s28   ;;  %v391_v43 = vadd.f32 %v680_v39, %v390_v42  ;;  %v408_v44 = vrot.slane %v407_v40, 4 }
 0x17a   : > { %s262_s25 = scalar_lea.vmem [#allocation6], %s955_s23  ;;  %s1040_s28 = scalar_lea.hbm %s1091_s5, %s580_s10 }
 0x17b   : > { %v392_v45 = vrot.slane %v391_v43, 2  ;;  %v409_v47 = vadd.f32 %v408_v44, %v407_v40  ;;  %s460_s29 = sshll.u32 %s262_s25, 4  ;;  %s435_s12 = scalar_lea.sflag [#allocation7], %s955_s23  ;;  %s1042_s29 = int_to_ptr.vmem [resolvable:$true] %s460_s29 }
 0x17c   : > { %s741_s14 = scalar_lea.vmem %s1042_s29, 16  ;;  %s820_s22 = smov [#allocation6]  }
 0x17d   : > { %v393_v46 = vadd.f32 %v392_v45, %v391_v43  ;;  %v410_v50 = vrot.slane %v409_v47, 2  ;;  %p742_p10 = scmp.ne.s32.totalorder %s1042_s29, %s741_s14  ;;  %s745_s15 = sshll.u32 %s820_s22, 4  ;;  %s746_s15 = int_to_ptr.vmem [resolvable:$false] %s745_s15 }
 0x17e   : > { %s747_s10 = scalar_lea.vmem %s746_s15, 32  ;;  %p748_p4 = scmp.lt.s32.totalorder %s1042_s29, %s746_s15 }
 0x17f   : > { %v394_v48 = vrot.slane %v393_v46, 1  ;;  %v411_v51 = vadd.f32 %v410_v50, %v409_v47  ;;  %p743_p0 = pnand %p742_p10, %p1098_p12  ;;  %p749_p5 = scmp.lt.s32.totalorder %s747_s10, %s741_s14 }
 0x181   : > { %v395_v49 = vadd.f32 %v394_v48, %v393_v46  ;;  %v412_v52 = vrot.slane %v411_v51, 1  ;;  %p744_p2 = pneg %p743_p0  ;;  %p750_p7 = por %p749_p5, %p748_p4 }
 0x183   : > { %681 = vlog2.f32 %v395_v49  ;;  %v413_v55 = vadd.f32 %v412_v52, %v411_v51  ;;  %p751_p9 = pnand %p750_p7, %p744_p2 }
 0x18d   : > { %v682_v53 = vpop.eup %681 }
 0x18e   : > { %v397_v54 = vmul.f32 0.6931472, %v682_v53 }
 0x190   : > { %v414_v56 = vsub.f32 %v397_v54, %v413_v55 }
 0x192   : > { %v415_v57 = vsel %vm380_vm5, %v414_v56, 0.0 }
 0x193   : > { %416 = vst [vmem:[%s262_s25] sm:$0x1] %v415_v57 }
 0x194   : > { %754 = shalt.err (!%p751_p9)
}
 0x195   : > { %s755_s23 = scalar_lea.hbm %s1040_s28, 16  ;;  %s759_s7 = scalar_lea.hbm %s1091_s5, 32 }
 0x196   : > { %p756_p1 = scmp.ne.s32.totalorder %s1040_s28, %s755_s23  ;;  %p760_p11 = scmp.lt.u32.totalorder %s1040_s28, %s1091_s5 }
 0x197   : > { %p761_p13 = scmp.lt.u32.totalorder %s759_s7, %s755_s23  ;;  %p763_p10 = scmp.lt.u32.totalorder %s755_s23, %s1040_s28 }
 0x198   : > { %p757_p3 = pnand %p756_p1, %p1098_p12 }
 0x199   : > { %p762_p8 = por %p761_p13, %p760_p11 }
 0x19a   : > { %p758_p6 = pneg %p757_p3 }
 0x19b   : > { %p764_p0 = por %p763_p10, %p762_p8 }
 0x19d   : > { %p765_p2 = pnand %p764_p0, %p758_p6 }
 0x19f   : > { %768 = shalt.err (!%p765_p2)
}
 0x1a0   : > { %617 = dma.vmem_to_hbm [thread:$0]  (%p1098_p12), %s1042_s29, 16, %s1040_s28, %s435_s12  }
 0x1a1 PF: > { %s472_s17 = sand.u32 1, %s799_s18   ;;  %p1099_p4 = scmp.ne.s32.totalorder %s1096_s6, 0 }
 0x1a2   : > { %p1100_p5 = scmp.ge.s32.totalorder %s811_s21, 2  ;;  %s473_s25 = scalar_lea.sflag [#allocation4], %s472_s17 }
 0x1a4   : > { %p625_p7 = pnand %p1100_p5, %p1099_p4 }
 0x1a6   : > { %790 = dma.done.wait (!%p625_p7), %s473_s25, 16  }
 0x1a7   : > { %792 = vsyncadd (!%p625_p7), %s473_s25, 4294967280  ;;  %s481_s13 = scalar_lea.sflag [#allocation7], %s472_s17 }
 0x1a8   : > { %794 = dma.done.wait (!%p625_p7), %s481_s13, 16  }
 0x1a9   : > { %796 = vsyncadd (!%p625_p7), %s481_s13, 4294967280  ;;  %p22_p12 = scmp.ge.s32.totalorder %s876_s24, 4   ;;  %s1101_s18 = smov %s803_s19 }
 0x1aa   : > { %s1102_s19 = smov %s807_s20  ;;  %s1103_s20 = smov %s888_s27 }
 0x1ab   : > { %s1104_s21 = smov %s876_s24  ;;  %24 = sbr.rel (!%p22_p12) target bundleno = 7 (0x7), region = 101 }
 0x1b2   :  { %485 = vsyncpa [#allocation3], 1 }
 0x1b3   :  { %487 = vsyncpa [#allocation3 + $0x1], 1 }
 0x1b4   :  { %488 = vsyncpa [#allocation4], 1 }
 0x1b5   :  { %490 = vsyncpa [#allocation4 + $0x1], 1 }
 0x1b6   :  { %491 = vsyncpa [#allocation7], 1 }
 0x1b7   :  { %493 = vsyncpa [#allocation7 + $0x1], 1 }

</bundles_post_ra>
